<compile_context>
chip_gen: v7x
topology: tpu7x:2x2x1
jax: 0.10.0
libtpu: 0.0.40
codegen_flags: <defaults>
</compile_context>

<pallas_src>
import jax
import jax.numpy as jnp
from jax import lax
from jax.experimental import pallas as pl
from jax.experimental.pallas import tpu as pltpu

EPS = 1e-5  # nn.BatchNorm2d default eps


def _round_up(x, m):
    return (x + m - 1) // m * m


def _vmem_capacity_bytes():
    try:
        return int(pltpu.get_tpu_info().vmem_capacity_bytes)
    except Exception:
        return 64 * 1024 * 1024  # v7x-safe lower bound


def _pick_tile_m(M, Kp, Cp, y_itemsize, budget, requested=None):
    """Largest multiple-of-8 row tile whose per-step working set fits `budget`."""
    fixed = 2 * Kp * Cp * 2 + 2 * 8 * Cp * 4          # double-buffered weight + stats
    per_row = 2 * Kp * 2 + 2 * Cp * max(y_itemsize, 4)  # patch tile (x2) + y/out tile (x2)
    avail = max(budget - fixed, 8 * per_row)
    tm = avail // per_row
    if requested is not None:
        tm = min(tm, requested)
    tm = min(tm, 2048, _round_up(M, 8))
    if M > 16:
        tm = min(tm, _round_up(pl.cdiv(M, 2), 8))     # >= 2 tiles -> both v7x TCs busy
    return max(8, (tm // 8) * 8)


# ------------------------------ Pallas kernels ------------------------------ #
def _matmul_stats_kernel(p_ref, w_ref, y_ref, stats_ref):
    """One M-tile: (TM, Kp) @ (Kp, Cp) -> bf16 y tile + f32 per-tile (sum, sumsq)."""
    y = jnp.dot(p_ref[...], w_ref[...], preferred_element_type=jnp.float32)
    y_ref[...] = y.astype(y_ref.dtype)                        # bf16 store (halved HBM)
    s = jnp.sum(y, axis=0, keepdims=True)                     # (1, Cp) f32
    ss = jnp.sum(y * y, axis=0, keepdims=True)                # (1, Cp) f32
    rows = lax.broadcasted_iota(jnp.int32, stats_ref.shape, 0)  # (8, Cp)
    stats_ref[...] = jnp.where(rows == 0, s, jnp.where(rows == 1, ss, 0.0))


def _matmul_tanh_kernel(p_ref, w_ref, o_ref):
    """One M-tile: matmul + tanh epilogue (f32 math; cast only at the store)."""
    y = jnp.dot(p_ref[...], w_ref[...], preferred_element_type=jnp.float32)
    o_ref[...] = jnp.tanh(y).astype(o_ref.dtype)


def _bn_apply_kernel(y_ref, scale_ref, shift_ref, o_ref):
    """One M-tile: bf16 y * f32 scale + f32 shift (per-channel affine)."""
    y = y_ref[...].astype(jnp.float32)
    o_ref[...] = (y * scale_ref[...] + shift_ref[...]).astype(o_ref.dtype)


# ------------------------------- GEMM driver -------------------------------- #
def _gemm_bn_or_tanh(patches, w_mat, gamma, beta, *, tanh, M, Cout, out_dtype, tm):
    K = patches.shape[1]
    Kp = _round_up(K, 128)
    Cp = _round_up(Cout, 128)   # note: 128 lanes fills half the MXU N on v6e/v7x,
                                # but real channel counts (256/512/1024) fill it.
    out_isz = jnp.dtype(out_dtype).itemsize

    vmem_cap = _vmem_capacity_bytes()
    vmem_limit = min(int(vmem_cap * 0.75), 100 * 1024 * 1024)
    budget = int(vmem_cap * 0.55)

    y_isz = out_isz if tanh else 2            # BN intermediate is stored as bf16
    tm_eff = _pick_tile_m(M, Kp, Cp, y_isz, budget, requested=tm)
    Mp = _round_up(M, tm_eff)
    n_tiles = Mp // tm_eff

    patches = jnp.pad(patches, ((0, Mp - M), (0, Kp - K)))   # zero rows -> zero y rows
    w_mat = jnp.pad(w_mat, ((0, Kp - K), (0, Cp - Cout)))

    cparams = pltpu.CompilerParams(
        dimension_semantics=("parallel",),
        vmem_limit_bytes=vmem_limit,
    )

    patch_spec = pl.BlockSpec((tm_eff, Kp), lambda i: (i, 0))
    # Constant block index: the pipeline fetches the weight once per core.
    w_spec = pl.BlockSpec((Kp, Cp), lambda i: (0, 0))
    row_spec = pl.BlockSpec((tm_eff, Cp), lambda i: (i, 0))

    if tanh:
        cost = pl.CostEstimate(
            flops=2 * Mp * Kp * Cp,
            transcendentals=Mp * Cp,
            bytes_accessed=Mp * Kp * 2 + Kp * Cp * 2 + Mp * Cp * out_isz)
        return pl.pallas_call(
            _matmul_tanh_kernel,
            out_shape=jax.ShapeDtypeStruct((Mp, Cp), out_dtype),
            grid=(n_tiles,),
            in_specs=[patch_spec, w_spec],
            out_specs=row_spec,
            compiler_params=cparams,
            cost_estimate=cost,
        )(patches, w_mat)

    # --- Pass 1: matmul + per-tile partial statistics (parallel over M tiles) ---
    cost1 = pl.CostEstimate(
        flops=2 * Mp * Kp * Cp + 3 * Mp * Cp,
        transcendentals=0,
        bytes_accessed=Mp * Kp * 2 + Kp * Cp * 2 + Mp * Cp * 2 + n_tiles * 8 * Cp * 4)
    y, stats = pl.pallas_call(
        _matmul_stats_kernel,
        out_shape=(
            jax.ShapeDtypeStruct((Mp, Cp), jnp.bfloat16),            # bf16 intermediate
            jax.ShapeDtypeStruct((n_tiles * 8, Cp), jnp.float32),
        ),
        grid=(n_tiles,),
        in_specs=[patch_spec, w_spec],
        out_specs=(row_spec, pl.BlockSpec((8, Cp), lambda i: (i, 0))),
        compiler_params=cparams,
        cost_estimate=cost1,
    )(patches, w_mat)

    # Tiny cross-tile reduction (training-mode BN stats over the real rows; padded
    # rows contribute exact zeros so dividing by M is exact).
    total = jnp.sum(stats.reshape(n_tiles, 8, Cp), axis=0)            # (8, Cp)
    mean = total[0] / M
    var = jnp.maximum(total[1] / M - mean * mean, 0.0)                # cancellation guard
    gamma_p = jnp.pad(gamma.astype(jnp.float32), (0, Cp - Cout))
    beta_p = jnp.pad(beta.astype(jnp.float32), (0, Cp - Cout))
    inv = lax.rsqrt(var + EPS)
    scale = (gamma_p * inv).reshape(1, Cp)
    shift = (beta_p - mean * gamma_p * inv).reshape(1, Cp)

    # --- Pass 2: streaming per-channel affine; allow a larger row tile ---
    tm2 = tm_eff
    for f in (8, 4, 2):
        cand = tm_eff * f
        if n_tiles % f == 0 and 2 * cand * Cp * (2 + out_isz) <= budget:
            tm2 = cand
            break
    n_tiles2 = Mp // tm2
    row_spec2 = pl.BlockSpec((tm2, Cp), lambda i: (i, 0))
    cost2 = pl.CostEstimate(
        flops=2 * Mp * Cp, transcendentals=0,
        bytes_accessed=Mp * Cp * (2 + out_isz) + 2 * Cp * 4)
    return pl.pallas_call(
        _bn_apply_kernel,
        out_shape=jax.ShapeDtypeStruct((Mp, Cp), out_dtype),
        grid=(n_tiles2,),
        in_specs=[row_spec2,
                  pl.BlockSpec((1, Cp), lambda i: (0, 0)),
                  pl.BlockSpec((1, Cp), lambda i: (0, 0))],
        out_specs=row_spec2,
        compiler_params=cparams,
        cost_estimate=cost2,
    )(y, scale, shift)


# --------------------------------- wrapper ----------------------------------- #
def upsample_conv_block(x, weight, gamma, beta, *, up_size, kernel_size, stride,
                        tanh=False, tm=None, compute_dtype=jnp.bfloat16):
    """x: (N, C_in, H, W) NCHW. weight: (C_out, C_in, k, k). Returns NCHW."""
    N, C, H, W = x.shape
    Cout = weight.shape[0]
    k = kernel_size
    out_dtype = x.dtype

    # NHWC + bf16 cast on the SMALL input tensor, before any upsample/gather.
    x_nhwc = x.transpose(0, 2, 3, 1).astype(compute_dtype)          # (N, H, W, C)

    fused_2x = (k == 3 and stride == 2 and up_size == 2 * H and up_size == 2 * W
                and H >= 2 and W >= 2)

    if fused_2x:
        # Fused nearest-2x-upsample + 3x3/stride-2 conv:
        #   x_up[i] = x[i//2]  =>  the nine taps over x_up reduce to four offset
        #   windows of the original x with pre-summed effective weights.
        Hout, Wout = H - 1, W - 1
        M = N * Hout * Wout
        crops = [x_nhwc[:, r:r + Hout, c:c + Wout, :] for r in (0, 1) for c in (0, 1)]
        patches = jnp.concatenate(crops, axis=-1).reshape(M, 4 * C)
        wf = weight.astype(jnp.float32)                              # sum taps in f32
        w_eff = jnp.stack([
            wf[:, :, 0, 0] + wf[:, :, 0, 1] + wf[:, :, 1, 0] + wf[:, :, 1, 1],  # (r=0,c=0)
            wf[:, :, 0, 2] + wf[:, :, 1, 2],                                    # (r=0,c=1)
            wf[:, :, 2, 0] + wf[:, :, 2, 1],                                    # (r=1,c=0)
            wf[:, :, 2, 2],                                                     # (r=1,c=1)
        ], axis=0)                                                   # (4, Cout, C)
        w_mat = w_eff.transpose(0, 2, 1).reshape(4 * C, Cout).astype(compute_dtype)
    else:
        # --- nn.UpsamplingNearest2d(size=(up_size, up_size)), in bf16 NHWC ---
        if up_size == H and up_size == W:
            x_up = x_nhwc
        elif up_size % H == 0 and up_size % W == 0:
            fh, fw = up_size // H, up_size // W                      # integer repeat
            x_up = jnp.broadcast_to(
                x_nhwc[:, :, None, :, None, :], (N, H, fh, W, fw, C)
            ).reshape(N, up_size, up_size, C)
        else:
            src_h = (jnp.arange(up_size) * H // up_size).astype(jnp.int32)
            src_w = (jnp.arange(up_size) * W // up_size).astype(jnp.int32)
            x_up = x_nhwc[:, src_h][:, :, src_w]

        Hout = (up_size - k) // stride + 1
        Wout = (up_size - k) // stride + 1
        M = N * Hout * Wout
        if k == 1:
            patches = x_up[:, 0:stride * Hout:stride,
                           0:stride * Wout:stride, :].reshape(M, C)
        else:
            # TODO(synk): generic k>1 fallback still materializes im2col; all of
            # the Generator's 3x3 layers take the fused 2x path above instead.
            cols = [x_up[:, kh:kh + stride * Hout:stride,
                         kw:kw + stride * Wout:stride, :]
                    for kh in range(k) for kw in range(k)]
            patches = jnp.concatenate(cols, axis=-1).reshape(M, C * k * k)
        w_mat = weight.transpose(2, 3, 1, 0).reshape(k * k * C, Cout).astype(compute_dtype)

    out2d = _gemm_bn_or_tanh(patches, w_mat, gamma, beta, tanh=tanh, M=M,
                             Cout=Cout, out_dtype=out_dtype, tm=tm)

    # TODO(synk): chained blocks could stay NHWC to skip this transpose (and the
    # one at the top); NCHW is kept here to match the PyTorch module's contract.
    return out2d[:M, :Cout].reshape(N, Hout, Wout, Cout).transpose(0, 3, 1, 2)


# ----------------------------- pure-JAX reference ---------------------------- #
def reference(x, weight, gamma, beta, *, up_size, kernel_size, stride,
              tanh=False, compute_dtype=jnp.bfloat16):
    N, C, H, W = x.shape
    src_h = (jnp.arange(up_size) * H // up_size).astype(jnp.int32)
    src_w = (jnp.arange(up_size) * W // up_size).astype(jnp.int32)
    x_up = x[:, :, src_h, :][:, :, :, src_w]
    y = lax.conv_general_dilated(
        x_up.astype(compute_dtype), weight.astype(compute_dtype),
        (stride, stride), 'VALID',
        dimension_numbers=('NCHW', 'OIHW', 'NCHW'),
        preferred_element_type=jnp.float32)
    if tanh:
        return jnp.tanh(y).astype(x.dtype)
    mean = jnp.mean(y, axis=(0, 2, 3), keepdims=True)
    var = jnp.mean((y - mean) ** 2, axis=(0, 2, 3), keepdims=True)
    out = ((y - mean) / jnp.sqrt(var + EPS) * gamma.reshape(1, -1, 1, 1)
           + beta.reshape(1, -1, 1, 1))
    return out.astype(x.dtype)


# ----------------------------------- main ------------------------------------ #
if __name__ == "__main__":
    key = jax.random.PRNGKey(0)
    kx, kcfg = jax.random.split(key)

    x = jax.random.normal(kx, (2, 4, 16, 16), dtype=jnp.float32)  # NCHW

    # Small configs covering the Generator's block shapes:
    #  - 1x1 conv + BN (identity / integer / non-integer upsample ratios)
    #  - fused 2x-upsample + 3x3 stride-2 conv + BN
    #  - generic-im2col 3x3 fallback
    #  - final 1x1 conv + Tanh
    configs = [
        dict(up_size=16, kernel_size=1, stride=1, tanh=False, out_channel=8, tm=None),
        dict(up_size=32, kernel_size=3, stride=2, tanh=False, out_channel=8, tm=128),  # fused 2x
        dict(up_size=32, kernel_size=1, stride=1, tanh=True,  out_channel=8, tm=128),
        dict(up_size=16, kernel_size=3, stride=2, tanh=False, out_channel=8, tm=128),  # generic im2col
        dict(up_size=24, kernel_size=1, stride=1, tanh=False, out_channel=8, tm=128),  # gather upsample
    ]

    ok = True
    for idx, cfg in enumerate(configs):
        kw_, kg_, kb_ = jax.random.split(jax.random.fold_in(kcfg, idx), 3)
        Cout, k = cfg["out_channel"], cfg["kernel_size"]
        weight = jax.random.normal(kw_, (Cout, 4, k, k), jnp.float32) * 0.1
        gamma = 1.0 + 0.1 * jax.random.normal(kg_, (Cout,), jnp.float32)
        beta = 0.1 * jax.random.normal(kb_, (Cout,), jnp.float32)

        out = upsample_conv_block(
            x, weight, gamma, beta, up_size=cfg["up_size"], kernel_size=k,
            stride=cfg["stride"], tanh=cfg["tanh"], tm=cfg["tm"])
        out = jax.block_until_ready(out)

        ref = reference(x, weight, gamma, beta, up_size=cfg["up_size"],
                        kernel_size=k, stride=cfg["stride"], tanh=cfg["tanh"])
        if out.shape != ref.shape or not jnp.allclose(out, ref, rtol=5e-3, atol=1e-2):
            ok = False

    if ok:
        print("KERNEL_OK")
</pallas_src>

<mosaic_0001>
module attributes {stable_mosaic.version = 11 : i64} {
  func.func @_matmul_stats_kernel(%arg0: i32, %arg1: memref<256x128xbf16, #tpu.memory_space<vmem>>, %arg2: memref<128x128xbf16, #tpu.memory_space<vmem>>, %arg3: memref<256x128xbf16, #tpu.memory_space<vmem>>, %arg4: memref<8x128xf32, #tpu.memory_space<vmem>>) attributes {dimension_semantics = [#tpu.dimension_semantics<parallel>], iteration_bounds = array<i64: 2>, scalar_prefetch = 0 : i64, scratch_operands = 0 : i64, tpu.core_type = #tpu.core_type<tc>, window_params = [{transform_indices = @transform_0, window_bounds = array<i64: 256, 128>}, {pipeline_mode = #tpu.pipeline_mode<synchronous>, transform_indices = @transform_1, window_bounds = array<i64: 128, 128>}, {transform_indices = @transform_2, window_bounds = array<i64: 256, 128>}, {transform_indices = @transform_3, window_bounds = array<i64: 8, 128>}]} {
    %c0 = arith.constant 0 : index
    %c0_0 = arith.constant 0 : index
    %0 = vector.load %arg1[%c0, %c0_0] : memref<256x128xbf16, #tpu.memory_space<vmem>>, vector<256x128xbf16>
    %c0_1 = arith.constant 0 : index
    %c0_2 = arith.constant 0 : index
    %1 = vector.load %arg2[%c0_1, %c0_2] : memref<128x128xbf16, #tpu.memory_space<vmem>>, vector<128x128xbf16>
    %cst = arith.constant dense<0.000000e+00> : vector<256x128xf32>
    %2 = tpu.matmul %0, %1, %cst {dimension_numbers = #tpu.dot_dimension_numbers<[1], [0], [0], [1], [0, 0, 1, 1], [], []>} : vector<256x128xbf16>, vector<128x128xbf16>, vector<256x128xf32> -> vector<256x128xf32>
    %3 = arith.truncf %2 : vector<256x128xf32> to vector<256x128xbf16>
    %c0_3 = arith.constant 0 : index
    %c0_4 = arith.constant 0 : index
    %4 = vector.load %arg3[%c0_3, %c0_4] : memref<256x128xbf16, #tpu.memory_space<vmem>>, vector<256x128xbf16>
    tpu.vector_store %arg3[%c0_3, %c0_4], %3 {strides = array<i32>} : memref<256x128xbf16, #tpu.memory_space<vmem>>, vector<256x128xbf16>,
    %cst_5 = arith.constant dense<0.000000e+00> : vector<128xf32>
    %5 = vector.multi_reduction <add>, %2, %cst_5 [0] : vector<256x128xf32> to vector<128xf32>
    %6 = vector.shape_cast %5 : vector<128xf32> to vector<1x128xf32>
    %7 = arith.mulf %2, %2 : vector<256x128xf32>
    %cst_6 = arith.constant dense<0.000000e+00> : vector<128xf32>
    %8 = vector.multi_reduction <add>, %7, %cst_6 [0] : vector<256x128xf32> to vector<128xf32>
    %9 = vector.shape_cast %8 : vector<128xf32> to vector<1x128xf32>
    %10 = tpu.iota {dimensions = array<i32: 0>} : vector<8x128xi32>
    %c0_i32 = arith.constant 0 : i32
    %11 = vector.broadcast %c0_i32 : i32 to vector<8x128xi32>
    %12 = arith.cmpi eq, %10, %11 : vector<8x128xi32>
    %c1_i32 = arith.constant 1 : i32
    %13 = vector.broadcast %c1_i32 : i32 to vector<8x128xi32>
    %14 = arith.cmpi eq, %10, %13 : vector<8x128xi32>
    %cst_7 = arith.constant 0.000000e+00 : f32
    %15 = vector.shape_cast %9 : vector<1x128xf32> to vector<1x128xf32>
    %16 = vector.broadcast %15 : vector<1x128xf32> to vector<8x128xf32>
    %17 = vector.broadcast %cst_7 : f32 to vector<8x128xf32>
    %18 = arith.select %14, %16, %17 : vector<8x128xi1>, vector<8x128xf32>
    %19 = vector.shape_cast %6 : vector<1x128xf32> to vector<1x128xf32>
    %20 = vector.broadcast %19 : vector<1x128xf32> to vector<8x128xf32>
    %21 = arith.select %12, %20, %18 : vector<8x128xi1>, vector<8x128xf32>
    %c0_8 = arith.constant 0 : index
    %c0_9 = arith.constant 0 : index
    %22 = vector.load %arg4[%c0_8, %c0_9] : memref<8x128xf32, #tpu.memory_space<vmem>>, vector<8x128xf32>
    tpu.vector_store %arg4[%c0_8, %c0_9], %21 {strides = array<i32>} : memref<8x128xf32, #tpu.memory_space<vmem>>, vector<8x128xf32>,
    return
  }
  func.func @transform_0(%arg0: i32) -> (i32, i32) {
    %c0_i32 = arith.constant 0 : i32
    %c0_i32_0 = arith.constant 0 : i32
    return %arg0, %c0_i32 : i32, i32
  }
  func.func @transform_1(%arg0: i32) -> (i32, i32) {
    %c0_i32 = arith.constant 0 : i32
    %c0_i32_0 = arith.constant 0 : i32
    %c0_i32_1 = arith.constant 0 : i32
    return %c0_i32, %c0_i32_0 : i32, i32
  }
  func.func @transform_2(%arg0: i32) -> (i32, i32) {
    %c0_i32 = arith.constant 0 : i32
    %c0_i32_0 = arith.constant 0 : i32
    return %arg0, %c0_i32 : i32, i32
  }
  func.func @transform_3(%arg0: i32) -> (i32, i32) {
    %c0_i32 = arith.constant 0 : i32
    %c0_i32_0 = arith.constant 0 : i32
    return %arg0, %c0_i32 : i32, i32
  }
}

</mosaic_0001>

<bundles_post_ra>
// kernel: tpu_custom_call.1
= control target key start
LH: loop header
LB: loop body
LE: loop exit
PB: predicated region body
PF: predicated region fallthrough
CT: control target
= control target key end

     0   :  { %9 = vsyncpa [#allocation3], 0  ;;  %s1938_s0 = inlined_call_operand.hbm [shape: bf16[512,128], index: 0, kind: input, shape index: {}]   ;;  %s1939_s1 = inlined_call_operand.hbm [shape: bf16[128,128], index: 1, kind: input, shape index: {}]   ;;  %s1940_s2 = inlined_call_operand.hbm [shape: bf16[512,128], index: 2, kind: output, shape index: {0}]   ;;  %s1941_s3 = inlined_call_operand.hbm [shape: f32[16,128], index: 3, kind: output, shape index: {1}]  }
   0x1   :  { %11 = vsyncpa [#allocation3 + $0x1], 0 }
   0x2   :  { %12 = vsyncpa [#allocation6], 0 }
   0x3   :  { %13 = vsyncpa [#allocation4], 0 }
   0x4   :  { %15 = vsyncpa [#allocation4 + $0x1], 0 }
   0x5   :  { %16 = vsyncpa [#allocation9], 0 }
   0x6   :  { %18 = vsyncpa [#allocation9 + $0x1], 0  ;;  %s1563_s12 = smov 0   ;;  %s1565_s13 = smov 0  }
   0x7   :  { %s1567_s14 = smov 0   ;;  %s1569_s15 = smov 0  }
   0x8 LB: > { %s1584_s16 = sadd.s32 4294967295, %s1533_s15   ;;  %s991_s17 = sadd.s32 4294967294, %s1533_s15   ;;  %s1533_s15 = sphi %s1569_s15, %s1961_s15   ;;  %s1529_s14 = sphi %s1567_s14, %s1960_s14   ;;  %s1525_s13 = sphi %s1565_s13, %s1959_s13   ;;  %s1521_s12 = sphi %s1563_s12, %s1958_s12  }
   0x9   : > { %p44_p0 = scmp.ne.s32.totalorder %s1525_s13, %s1521_s12  ;;  %p1942_p1 = scmp.eq.s32.totalorder %s1584_s16, 0 }
   0xa   : > { %p95_p3 = scmp.eq.s32.totalorder %s991_s17, 1  ;;  %p992_p5 = scmp.ge.s32.totalorder %s1533_s15, 1 }
   0xb   : > { %p1593_p4 = por %p1942_p1, %p44_p0  ;;  %p128_p7 = scmp.lt.s32.totalorder %s1533_s15, 3 }
   0xc   : > { %p1598_p6 = por %p95_p3, %p44_p0  ;;  %s1535_s21 = smov [#allocation5]  }
   0xd   : > { %s1945_s18 = scalar_select %p1593_p4, 1, 0 }
   0xe   : > { %s1946_s19 = scalar_select %p1598_p6, 1, 0 }
   0xf   : > { %p1603_p8 = pnand %p992_p5, %p128_p7  ;;  %s140_s22 = sshll.u32 %s1535_s21, 4  ;;  %s1607_s22 = int_to_ptr.vmem [resolvable:$true] %s140_s22 }
  0x10   : > { %s1619_s24 = sadd.s32 1, %s1533_s15   ;;  %s31_s25 = sadd.s32 1, %s1529_s14 }
  0x11   : > { %s1947_s20 = scalar_select %p1603_p8, 1, 0 }
  0x12   : > { %p1293_p9 = pneg %p1603_p8  ;;  %s28_s26 = ssub.s32 %s1533_s15, %s1619_s24 }
  0x13   : > { %s1373_s29 = scalar_lea.hbm %s1939_s1, 1024 }
  0x14   : > { %p1614_p11 = pnand %p1293_p9, %p1942_p1  ;;  %p1374_p12 = scmp.ne.s32.totalorder %s1939_s1, %s1373_s29 }
  0x15   : > { %p1380_p5 = scmp.lt.u32.totalorder %s1373_s29, %s1939_s1 }
  0x16   : > { %p1375_p13 = pneg %p1614_p11 }
  0x18   : > { %p1376_p0 = pnand %p1375_p13, %p1374_p12 }
  0x1a   : > { %p1377_p3 = pneg %p1376_p0 }
  0x1c   : > { %p1382_p7 = pnand %p1380_p5, %p1377_p3 }
  0x1e   : > { %1385 = shalt.err (!%p1382_p7)
}
  0x1f   : > { %s1386_s7 = scalar_lea.vmem %s1607_s22, 1024  ;;  %p1394_p2 = scmp.lt.s32.totalorder %s1607_s22, %s1607_s22 }
  0x20   : > { %p1387_p9 = scmp.ne.s32.totalorder %s1607_s22, %s1386_s7  ;;  %p1395_p6 = scmp.lt.s32.totalorder %s1386_s7, %s1386_s7 }
  0x22   : > { %p1389_p10 = pnand %p1387_p9, %p1375_p13  ;;  %p1396_p4 = por %p1395_p6, %p1394_p2 }
  0x24   : > { %p1390_p1 = pneg %p1389_p10 }
  0x26   : > { %p1397_p8 = pnand %p1396_p4, %p1390_p1 }
  0x28   : > { %1400 = shalt.err (!%p1397_p8)
}
  0x29   : > { %s1536_s8 = smov 64   ;;  %s1537_s9 = smov 4  }
  0x2a   : > { %1296 = dma.hbm_to_vmem [thread:$0]  (!%p1614_p11), %s1939_s1, 1024, %s1607_s22, [#allocation6], %s1536_s8, %s1536_s8, %s1537_s9  }
  0x2b   : > { %p29_p1 = scmp.eq.s32.totalorder %s28_s26, 0  ;;  %p38_p2 = scmp.ne.s32.totalorder %s1529_s14, %s1525_s13 }
  0x2c   : > { %p39_p4 = scmp.eq.s32.totalorder %s1533_s15, 0  ;;  %p1309_p6 = scmp.lt.s32.totalorder %s1533_s15, 2 }
  0x2d   : > { %s1653_s17 = scalar_select %p29_p1, %s1529_s14, %s31_s25  }
  0x2e   : > { %p40_p8 = por %p39_p4, %p38_p2  ;;  %p1949_p10 = scmp.eq.s32.totalorder %s1584_s16, 1 }
  0x2f   : > { %s154_s23 = sand.u32 1, %s1529_s14   ;;  %s1066_s27 = sshll.u32 %s1533_s15, 11 }
  0x30   : > { %p1657_p12 = por %p1949_p10, %p38_p2  ;;  %s995_s28 = sshll.u32 %s154_s23, 7 }
  0x31   : > { %s1666_s4 = scalar_lea.hbm %s1938_s0, %s1066_s27  ;;  %s158_s22 = scalar_lea.vmem [#allocation2], %s995_s28 }
  0x32   : > { %s165_s25 = sshll.u32 %s158_s22, 4  ;;  %p1668_p11 = pnand %p1309_p6, %p40_p8  ;;  %s1672_s25 = int_to_ptr.vmem [resolvable:$true] %s165_s25 }
  0x33   : > { %s1674_s5 = scalar_lea.sflag [#allocation3], %s154_s23  ;;  %s1401_s6 = scalar_lea.hbm %s1666_s4, 2048 }
  0x34   : > { %p1402_p13 = scmp.ne.s32.totalorder %s1666_s4, %s1401_s6  ;;  %p1403_p0 = pneg %p1668_p11 }
  0x35   : > { %s1406_s11 = scalar_lea.hbm %s1938_s0, 4096  ;;  %p1407_p7 = scmp.lt.u32.totalorder %s1666_s4, %s1938_s0 }
  0x36   : > { %p1404_p3 = pnand %p1403_p0, %p1402_p13  ;;  %p1408_p9 = scmp.lt.u32.totalorder %s1406_s11, %s1401_s6 }
  0x37   : > { %p1410_p2 = scmp.lt.u32.totalorder %s1401_s6, %s1666_s4 }
  0x38   : > { %p1405_p5 = pneg %p1404_p3  ;;  %p1409_p1 = por %p1408_p9, %p1407_p7 }
  0x3a   : > { %p1411_p4 = por %p1410_p2, %p1409_p1 }
  0x3c   : > { %p1412_p6 = pnand %p1411_p4, %p1405_p5 }
  0x3e   : > { %1415 = shalt.err (!%p1412_p6)
}
  0x3f   : > { %s1416_s23 = scalar_lea.vmem %s1672_s25, 2048  ;;  %s1538_s29 = smov [#allocation2]  }
  0x40   : > { %p1417_p8 = scmp.ne.s32.totalorder %s1672_s25, %s1416_s23  ;;  %s1421_s30 = sshll.u32 %s1538_s29, 4  ;;  %s1422_s30 = int_to_ptr.vmem [resolvable:$false] %s1421_s30 }
  0x41   : > { %s1423_s22 = scalar_lea.vmem %s1422_s30, 4096  ;;  %p1424_p3 = scmp.lt.s32.totalorder %s1672_s25, %s1422_s30 }
  0x42   : > { %p1419_p10 = pnand %p1417_p8, %p1403_p0  ;;  %p1425_p7 = scmp.lt.s32.totalorder %s1423_s22, %s1416_s23 }
  0x44   : > { %p1420_p13 = pneg %p1419_p10  ;;  %p1426_p9 = por %p1425_p7, %p1424_p3 }
  0x46   : > { %p1427_p1 = pnand %p1426_p9, %p1420_p13 }
  0x48   : > { %1430 = shalt.err (!%p1427_p1)
}
  0x49   : > { %1300 = dma.hbm_to_vmem [thread:$0]  (!%p1668_p11), %s1666_s4, 2048, %s1672_s25, %s1674_s5, %s1536_s8, %s1536_s8, %s1537_s9  }
  0x4a   : > { %p1952_p0 = scmp.ne.s32.totalorder %s1947_s20, 0 }
  0x4b   : > { %s1708_s6 = sand.u32 (!%p1952_p0), 1, %s1525_s13   ;;  %p1953_p5 = scmp.ne.s32.totalorder (!%p1952_p0), %s1945_s18, 0 }
  0x4c   : > { %177 = sbr.rel (%p1952_p0) target bundleno = 438 (0x1b6), region = 28  ;;  %s999_s7 = sshll.u32 (!%p1952_p0), %s1708_s6, 7 }
  0x4d   : > { %s180_s10 = scalar_lea.sflag (!%p1952_p0), [#allocation3], %s1708_s6  ;;  %s1714_s26 = scalar_lea.vmem (!%p1952_p0), [#allocation2], %s999_s7 }
  0x53   : > { %1504 = dma.done.wait (%p1953_p5), %s180_s10, 2048  }
  0x54   : > { %1506 = vsyncadd (%p1953_p5), %s180_s10, 4294965248  ;;  %p1954_p11 = scmp.eq.s32.totalorder %s1584_s16, 0 }
  0x56   : > { %1508 = dma.done.wait (%p1954_p11), [#allocation6], 1024   ;;  %p1955_p2 = pmov %p1954_p11 }
  0x57   : > { %v1349_v0 = vld [vmem:[#allocation5] sm:$0xff]   ;;  %v1350_v1 = vld [vmem:[#allocation5 + $0x8] sm:$0xff]   ;;  %v1351_v2 = vld [vmem:[#allocation5 + $0x10] sm:$0xff]   ;;  %s1754_s18 = scalar_lea.vmem [#allocation7], %s999_s7  ;;  %s1099_s20 = sshll.u32 %s1584_s16, 11 }
  0x58   : > { %1510 = vsyncadd (%p1955_p2), [#allocation6], 4294966272  ;;  %1219 = vmatprep.subr.bf16.mxu0 %v1349_v0  ;;  %1267 = vmatprep.subr.bf16.mxu1 %v1349_v0  ;;  %v1352_v3 = vld [vmem:[#allocation5 + $0x18] sm:$0xff]   ;;  %v1357_v4 = vld [vmem:[%s1714_s26] sm:$0xff]   ;;  %s863_s8 = sshll.u32 %s1754_s18, 4  ;;  %s1807_s25 = scalar_lea.hbm %s1940_s2, %s1099_s20  ;;  %s1809_s8 = int_to_ptr.vmem [resolvable:$true] %s863_s8 }
  0x59   : > { %1220 = vmatpush3.bf16.msra.mxu0 %v1349_v0  ;;  %1275 = vmatpush3.bf16.msra.mxu1 %v1349_v0  ;;  %v1353_v5 = vld [vmem:[#allocation5 + $0x20] sm:$0xff]   ;;  %v1354_v6 = vld [vmem:[#allocation5 + $0x28] sm:$0xff]   ;;  %v1355_v8 = vld [vmem:[#allocation5 + $0x30] sm:$0xff]   ;;  %s845_s5 = scalar_lea.sflag [#allocation4], %s1708_s6  ;;  %s1431_s11 = scalar_lea.vmem %s1809_s8, 2048 }
  0x5a   : > { %1221 = vmatprep.subr.bf16.mxu0 %v1350_v1  ;;  %1268 = vmatprep.subr.bf16.mxu1 %v1350_v1  ;;  %v1365_v7 = vld [vmem:[%s1714_s26 + $0x40] sm:$0xff]   ;;  %v1356_v9 = vld [vmem:[#allocation5 + $0x38] sm:$0xff]   ;;  %v1358_v10 = vld [vmem:[%s1714_s26 + $0x8] sm:$0xff]   ;;  %p1432_p4 = scmp.ne.s32.totalorder %s1809_s8, %s1431_s11  ;;  %s1539_s27 = smov [#allocation7]  }
  0x5b   : > { %1235 = vmatprep.mubr.bf16.mxu0 %v1357_v4  ;;  %1251 = vmatprep.mubr.bf16.mxu1 %v1365_v7  ;;  %v1366_v11 = vld [vmem:[%s1714_s26 + $0x48] sm:$0xff]   ;;  %v1359_v12 = vld [vmem:[%s1714_s26 + $0x10] sm:$0xff]   ;;  %v1360_v14 = vld [vmem:[%s1714_s26 + $0x18] sm:$0xff]   ;;  %s1435_s28 = sshll.u32 %s1539_s27, 4  ;;  %s1436_s28 = int_to_ptr.vmem [resolvable:$false] %s1435_s28 }
  0x5c   : > { %v1367_v13 = vld [vmem:[%s1714_s26 + $0x50] sm:$0xff]   ;;  %v1368_v15 = vld [vmem:[%s1714_s26 + $0x58] sm:$0xff]   ;;  %v1361_v16 = vld [vmem:[%s1714_s26 + $0x20] sm:$0xff]   ;;  %p1433_p6 = pnand %p1432_p4, %p1657_p12  ;;  %s1437_s23 = scalar_lea.vmem %s1436_s28, 4096 }
  0x5d   : > { %1222 = vmatpush3.bf16.msra.mxu0 %v1350_v1  ;;  %1276 = vmatpush3.bf16.msra.mxu1 %v1350_v1  ;;  %v1369_v17 = vld [vmem:[%s1714_s26 + $0x60] sm:$0xff]   ;;  %v1362_v18 = vld [vmem:[%s1714_s26 + $0x28] sm:$0xff]   ;;  %v1363_v20 = vld [vmem:[%s1714_s26 + $0x30] sm:$0xff]   ;;  %p1438_p10 = scmp.lt.s32.totalorder %s1809_s8, %s1436_s28  ;;  %p1439_p13 = scmp.lt.s32.totalorder %s1437_s23, %s1431_s11 }
  0x5e   : > { %1223 = vmatprep.subr.bf16.mxu0 %v1351_v2  ;;  %1269 = vmatprep.subr.bf16.mxu1 %v1351_v2  ;;  %v1370_v19 = vld [vmem:[%s1714_s26 + $0x68] sm:$0xff]   ;;  %v1371_v21 = vld [vmem:[%s1714_s26 + $0x70] sm:$0xff]   ;;  %v1364_v22 = vld [vmem:[%s1714_s26 + $0x38] sm:$0xff]   ;;  %p1434_p8 = pneg %p1433_p6 }
  0x5f   : > { %v1372_v23 = vld [vmem:[%s1714_s26 + $0x78] sm:$0xff]   ;;  %p1440_p3 = por %p1439_p13, %p1438_p10 }
  0x61   : > { %1224 = vmatpush3.bf16.msra.mxu0 %v1351_v2  ;;  %1277 = vmatpush3.bf16.msra.mxu1 %v1351_v2  ;;  %p1441_p7 = pnand %p1440_p3, %p1434_p8 }
  0x62   : > { %1225 = vmatprep.subr.bf16.mxu0 %v1352_v3  ;;  %1270 = vmatprep.subr.bf16.mxu1 %v1352_v3 }
  0x65   : > { %1226 = vmatpush3.bf16.msra.mxu0 %v1352_v3  ;;  %1278 = vmatpush3.bf16.msra.mxu1 %v1352_v3 }
  0x66   : > { %1227 = vmatprep.subr.bf16.mxu0 %v1353_v5  ;;  %1271 = vmatprep.subr.bf16.mxu1 %v1353_v5 }
  0x69   : > { %1228 = vmatpush3.bf16.msra.mxu0 %v1353_v5  ;;  %1279 = vmatpush3.bf16.msra.mxu1 %v1353_v5 }
  0x6a   : > { %1229 = vmatprep.subr.bf16.mxu0 %v1354_v6  ;;  %1272 = vmatprep.subr.bf16.mxu1 %v1354_v6 }
  0x6d   : > { %1230 = vmatpush3.bf16.msra.mxu0 %v1354_v6  ;;  %1280 = vmatpush3.bf16.msra.mxu1 %v1354_v6 }
  0x6e   : > { %1231 = vmatprep.subr.bf16.mxu0 %v1355_v8  ;;  %1273 = vmatprep.subr.bf16.mxu1 %v1355_v8 }
  0x71   : > { %1232 = vmatpush3.bf16.msra.mxu0 %v1355_v8  ;;  %1281 = vmatpush3.bf16.msra.mxu1 %v1355_v8 }
  0x72   : > { %1233 = vmatprep.subr.bf16.mxu0 %v1356_v9  ;;  %1274 = vmatprep.subr.bf16.mxu1 %v1356_v9 }
  0x75   : > { %1234 = vmatpush3.bf16.msra.mxu0 %v1356_v9  ;;  %1282 = vmatpush3.bf16.msra.mxu1 %v1356_v9 }
  0x78   : > { %1236 = vmatmul.mubr.bf16.vlgmr.msra.gmra.mrb[0].mxu0 %v1358_v10  ;;  %1252 = vmatmul.mubr.bf16.vlgmr.msra.gmra.mrb[0].mxu1 %v1366_v11 }
  0x79   : > { %1239 = vmatprep.mubr.bf16.mxu0 %v1359_v12  ;;  %1255 = vmatprep.mubr.bf16.mxu1 %v1367_v13 }
  0x80   : > { %1240 = vmatmul.mubr.bf16.gmra.mrb[4].mxu0 %v1360_v14  ;;  %1256 = vmatmul.mubr.bf16.gmra.mrb[4].mxu1 %v1368_v15 }
  0x81   : > { %1243 = vmatprep.mubr.bf16.mxu0 %v1361_v16  ;;  %1259 = vmatprep.mubr.bf16.mxu1 %v1369_v17 }
  0x88   : > { %1244 = vmatmul.mubr.bf16.gmra.mrb[8].mxu0 %v1362_v18  ;;  %1260 = vmatmul.mubr.bf16.gmra.mrb[8].mxu1 %v1370_v19 }
  0x89   : > { %1247 = vmatprep.mubr.bf16.mxu0 %v1363_v20  ;;  %1263 = vmatprep.mubr.bf16.mxu1 %v1371_v21 }
  0x90   : > { %1248 = vmatmul.mubr.bf16.gmra.mrb[12].mxu0 %v1364_v22  ;;  %1264 = vmatmul.mubr.bf16.gmra.mrb[12].mxu1 %v1372_v23 }
 0x14b   : > { %v1237_v24 = vpop.f32.mrb[0].mxu0  ;;  %v1740_v25 = vpop.f32.mrb[0].mxu1 }
 0x14c   : > { %v444_v26 = vpop.f32.mrb[1].mxu0  ;;  %v1742_v27 = vpop.f32.mrb[1].mxu1  ;;  %v770_v39 = vmul.f32 %v1237_v24, %v1237_v24 }
 0x14d   : > { %v1238_v28 = vpop.f32.mrb[2].mxu0  ;;  %v1744_v29 = vpop.f32.mrb[2].mxu1  ;;  %v768_v30 = vmul.f32 %v444_v26, %v444_v26 }
 0x14e   : > { %v1108_v31 = vpack.c.bf16 %v1238_v28, %v1237_v24  ;;  %v447_v32 = vpop.f32.mrb[3].mxu0  ;;  %v1148_v33 = vpack.c.bf16 %v1744_v29, %v1740_v25  ;;  %v1748_v34 = vpop.f32.mrb[3].mxu1  ;;  %v771_v42 = vmul.f32 %v1238_v28, %v1238_v28 }
 0x14f   : > { %v1103_v35 = vpack.c.bf16 %v447_v32, %v444_v26  ;;  %v731_v36 = vadd.f32 %v447_v32, %v444_v26  ;;  %v769_v37 = vmul.f32 %v447_v32, %v447_v32  ;;  %v1143_v38 = vpack.c.bf16 %v1748_v34, %v1742_v27 }
 0x150   : > { %1180 = vst [vmem:[%s1754_s18 + $0x8] sm:$0xff] %v1108_v31   ;;  %1188 = vst [vmem:[%s1754_s18 + $0x48] sm:$0xff] %v1148_v33  }
 0x151   : > { %1104 = vst [vmem:[%s1754_s18] sm:$0xff] %v1103_v35   ;;  %v732_v40 = vadd.f32 %v1237_v24, %v731_v36  ;;  %v800_v41 = vadd.f32 %v769_v37, %v768_v30  ;;  %1187 = vst [vmem:[%s1754_s18 + $0x40] sm:$0xff] %v1143_v38  }
 0x153   : > { %v801_v43 = vadd.f32 %v800_v41, %v770_v39  ;;  %v1241_v44 = vpop.f32.mrb[4].mxu0  ;;  %v733_v45 = vadd.f32 %v1238_v28, %v732_v40  ;;  %v1760_v46 = vpop.f32.mrb[4].mxu1 }
 0x154   : > { %v460_v47 = vpop.f32.mrb[5].mxu0  ;;  %v1762_v48 = vpop.f32.mrb[5].mxu1  ;;  %v774_v63 = vmul.f32 %v1241_v44, %v1241_v44 }
 0x155   : > { %v734_v49 = vadd.f32 %v733_v45, %v460_v47  ;;  %v772_v50 = vmul.f32 %v460_v47, %v460_v47  ;;  %v802_v51 = vadd.f32 %v801_v43, %v771_v42  ;;  %v1242_v52 = vpop.f32.mrb[6].mxu0  ;;  %v1764_v53 = vpop.f32.mrb[6].mxu1 }
 0x156   : > { %v1118_v54 = vpack.c.bf16 %v1242_v52, %v1241_v44  ;;  %v463_v55 = vpop.f32.mrb[7].mxu0  ;;  %v1158_v56 = vpack.c.bf16 %v1764_v53, %v1760_v46  ;;  %v1768_v57 = vpop.f32.mrb[7].mxu1  ;;  %v775_v2 = vmul.f32 %v1242_v52, %v1242_v52 }
 0x157   : > { %v803_v58 = vadd.f32 %v802_v51, %v772_v50  ;;  %v1113_v59 = vpack.c.bf16 %v463_v55, %v460_v47  ;;  %v735_v60 = vadd.f32 %v734_v49, %v463_v55  ;;  %v773_v61 = vmul.f32 %v463_v55, %v463_v55 }
 0x158   : > { %1182 = vst [vmem:[%s1754_s18 + $0x18] sm:$0xff] %v1118_v54   ;;  %1190 = vst [vmem:[%s1754_s18 + $0x58] sm:$0xff] %v1158_v56   ;;  %v1153_v62 = vpack.c.bf16 %v1768_v57, %v1762_v48 }
 0x159   : > { %1181 = vst [vmem:[%s1754_s18 + $0x10] sm:$0xff] %v1113_v59   ;;  %v736_v0 = vadd.f32 %v1241_v44, %v735_v60  ;;  %v804_v1 = vadd.f32 %v803_v58, %v773_v61  ;;  %v784_v61 = vmul.f32 %v1742_v27, %v1742_v27 }
 0x15a   : > { %1189 = vst [vmem:[%s1754_s18 + $0x50] sm:$0xff] %v1153_v62  }
 0x15b   : > { %v805_v3 = vadd.f32 %v804_v1, %v774_v63  ;;  %v1245_v4 = vpop.f32.mrb[8].mxu0  ;;  %v737_v5 = vadd.f32 %v1242_v52, %v736_v0  ;;  %v1776_v6 = vpop.f32.mrb[8].mxu1 }
 0x15c   : > { %v476_v7 = vpop.f32.mrb[9].mxu0  ;;  %v1778_v8 = vpop.f32.mrb[9].mxu1  ;;  %v778_v23 = vmul.f32 %v1245_v4, %v1245_v4 }
 0x15d   : > { %v738_v9 = vadd.f32 %v737_v5, %v476_v7  ;;  %v776_v10 = vmul.f32 %v476_v7, %v476_v7  ;;  %v806_v11 = vadd.f32 %v805_v3, %v775_v2  ;;  %v1246_v12 = vpop.f32.mrb[10].mxu0  ;;  %v1780_v13 = vpop.f32.mrb[10].mxu1 }
 0x15e   : > { %v1128_v14 = vpack.c.bf16 %v1246_v12, %v1245_v4  ;;  %v479_v15 = vpop.f32.mrb[11].mxu0  ;;  %v1168_v16 = vpack.c.bf16 %v1780_v13, %v1776_v6  ;;  %v1784_v17 = vpop.f32.mrb[11].mxu1  ;;  %v779_v28 = vmul.f32 %v1246_v12, %v1246_v12 }
 0x15f   : > { %v807_v18 = vadd.f32 %v806_v11, %v776_v10  ;;  %v1123_v19 = vpack.c.bf16 %v479_v15, %v476_v7  ;;  %v739_v20 = vadd.f32 %v738_v9, %v479_v15  ;;  %v777_v21 = vmul.f32 %v479_v15, %v479_v15 }
 0x160   : > { %1184 = vst [vmem:[%s1754_s18 + $0x28] sm:$0xff] %v1128_v14   ;;  %1192 = vst [vmem:[%s1754_s18 + $0x68] sm:$0xff] %v1168_v16   ;;  %v1163_v22 = vpack.c.bf16 %v1784_v17, %v1778_v8 }
 0x161   : > { %1183 = vst [vmem:[%s1754_s18 + $0x20] sm:$0xff] %v1123_v19   ;;  %v740_v24 = vadd.f32 %v1245_v4, %v739_v20  ;;  %v808_v26 = vadd.f32 %v807_v18, %v777_v21 }
 0x162   : > { %1191 = vst [vmem:[%s1754_s18 + $0x60] sm:$0xff] %v1163_v22  }
 0x163   : > { %v809_v30 = vadd.f32 %v808_v26, %v778_v23  ;;  %v1249_v31 = vpop.f32.mrb[12].mxu0  ;;  %v741_v32 = vadd.f32 %v1246_v12, %v740_v24  ;;  %v1792_v33 = vpop.f32.mrb[12].mxu1 }
 0x164   : > { %v492_v35 = vpop.f32.mrb[13].mxu0  ;;  %v1794_v36 = vpop.f32.mrb[13].mxu1  ;;  %v782_v54 = vmul.f32 %v1249_v31, %v1249_v31 }
 0x165   : > { %v742_v37 = vadd.f32 %v741_v32, %v492_v35  ;;  %v780_v38 = vmul.f32 %v492_v35, %v492_v35  ;;  %v810_v39 = vadd.f32 %v809_v30, %v779_v28  ;;  %v1250_v40 = vpop.f32.mrb[14].mxu0  ;;  %v1798_v41 = vpop.f32.mrb[14].mxu1 }
 0x166   : > { %v1138_v42 = vpack.c.bf16 %v1250_v40, %v1249_v31  ;;  %v495_v43 = vpop.f32.mrb[15].mxu0  ;;  %v1178_v44 = vpack.c.bf16 %v1798_v41, %v1792_v33  ;;  %v1802_v45 = vpop.f32.mrb[15].mxu1  ;;  %v783_v58 = vmul.f32 %v1250_v40, %v1250_v40 }
 0x167   : > { %v811_v47 = vadd.f32 %v810_v39, %v780_v38  ;;  %v1133_v49 = vpack.c.bf16 %v495_v43, %v492_v35  ;;  %v743_v50 = vadd.f32 %v742_v37, %v495_v43  ;;  %v781_v51 = vmul.f32 %v495_v43, %v495_v43 }
 0x168   : > { %1186 = vst [vmem:[%s1754_s18 + $0x38] sm:$0xff] %v1138_v42   ;;  %1194 = vst [vmem:[%s1754_s18 + $0x78] sm:$0xff] %v1178_v44   ;;  %v1173_v52 = vpack.c.bf16 %v1802_v45, %v1794_v36 }
 0x169   : > { %1185 = vst [vmem:[%s1754_s18 + $0x30] sm:$0xff] %v1133_v49   ;;  %v744_v55 = vadd.f32 %v1249_v31, %v743_v50  ;;  %v812_v56 = vadd.f32 %v811_v47, %v781_v51 }
 0x16a   : > { %1193 = vst [vmem:[%s1754_s18 + $0x70] sm:$0xff] %v1173_v52  }
 0x16b   : > { %v813_v59 = vadd.f32 %v812_v56, %v782_v54  ;;  %v745_v60 = vadd.f32 %v1250_v40, %v744_v55 }
 0x16c   : > { %1444 = shalt.err (!%p1441_p7)
}
 0x16d   : > { %s1445_s29 = scalar_lea.hbm %s1807_s25, 2048  ;;  %s1449_s7 = scalar_lea.hbm %s1940_s2, 4096 }
 0x16e   : > { %p1446_p9 = scmp.ne.s32.totalorder %s1807_s25, %s1445_s29  ;;  %p1450_p5 = scmp.lt.u32.totalorder %s1807_s25, %s1940_s2 }
 0x16f   : > { %p1451_p11 = scmp.lt.u32.totalorder %s1449_s7, %s1445_s29  ;;  %p1453_p4 = scmp.lt.u32.totalorder %s1445_s29, %s1807_s25 }
 0x170   : > { %p1447_p1 = pnand %p1446_p9, %p1657_p12 }
 0x171   : > { %p1452_p2 = por %p1451_p11, %p1450_p5 }
 0x172   : > { %p1448_p0 = pneg %p1447_p1 }
 0x173   : > { %p1454_p6 = por %p1453_p4, %p1452_p2 }
 0x175   : > { %p1455_p8 = pnand %p1454_p6, %p1448_p0 }
 0x177   : > { %1458 = shalt.err (!%p1455_p8)
}
 0x178   : > { %s1540_s18 = smov 64   ;;  %s1541_s20 = smov 4   ;;  %v746_v62 = vadd.f32 %v745_v60, %v1742_v27  ;;  %v814_v63 = vadd.f32 %v813_v59, %v783_v58  ;;  %v785_v2 = vmul.f32 %v1748_v34, %v1748_v34  ;;  %v786_v3 = vmul.f32 %v1740_v25, %v1740_v25 }
 0x179   : > { %1289 = dma.vmem_to_hbm [thread:$0]  (%p1657_p12), %s1809_s8, 2048, %s1807_s25, %s845_s5, %s1540_s18, %s1540_s18, %s1541_s20   ;;  %v787_v7 = vmul.f32 %v1744_v29, %v1744_v29  ;;  %v788_v27 = vmul.f32 %v1762_v48, %v1762_v48  ;;  %v789_v15 = vmul.f32 %v1768_v57, %v1768_v57  ;;  %v793_v24 = vmul.f32 %v1784_v17, %v1784_v17 }
 0x17a   : > { %v815_v0 = vadd.f32 %v814_v63, %v784_v61  ;;  %v747_v1 = vadd.f32 %v746_v62, %v1748_v34  ;;  %v798_v38 = vmul.f32 %v1792_v33, %v1792_v33  ;;  %v837_v50 = vlaneseq  ;;  %s1002_s8 = sshll.u32 %s1708_s6, 3  ;;  %s1063_s9 = sshll.u32 %s1584_s16, 7 }
 0x17b   : > { %s214_s4 = scalar_lea.vmem [#allocation8], %s1002_s8  ;;  %s1894_s27 = scalar_lea.hbm %s1941_s3, %s1063_s9 }
 0x17c   : > { %v748_v4 = vadd.f32 %v1740_v25, %v747_v1  ;;  %v816_v5 = vadd.f32 %v815_v0, %v785_v2  ;;  %v790_v25 = vmul.f32 %v1760_v46, %v1760_v46  ;;  %v838_v55 = vshrl.u32 %v837_v50, 7  ;;  %s879_s25 = sshll.u32 %s214_s4, 4  ;;  %s850_s28 = scalar_lea.sflag [#allocation9], %s1708_s6  ;;  %s1896_s25 = int_to_ptr.vmem [resolvable:$true] %s879_s25 }
 0x17d   : > { %s1459_s16 = scalar_lea.vmem %s1896_s25, 128  ;;  %s1542_s23 = smov [#allocation8]  }
 0x17e   : > { %v817_v9 = vadd.f32 %v816_v5, %v786_v3  ;;  %v749_v10 = vadd.f32 %v1744_v29, %v748_v4  ;;  %v791_v29 = vmul.f32 %v1764_v53, %v1764_v53  ;;  %vm840_vm0 = vcmp.eq.s32.totalorder %v838_v55, 1  ;;  %p1460_p10 = scmp.ne.s32.totalorder %s1896_s25, %s1459_s16  ;;  %s1463_s29 = sshll.u32 %s1542_s23, 4  ;;  %s1464_s29 = int_to_ptr.vmem [resolvable:$false] %s1463_s29 }
 0x17f   : > { %vm839_vm1 = vcmp.eq.s32.totalorder %v838_v55, 0  ;;  %s1465_s30 = scalar_lea.vmem %s1464_s29, 256  ;;  %p1466_p7 = scmp.lt.s32.totalorder %s1896_s25, %s1464_s29 }
 0x180   : > { %v750_v11 = vadd.f32 %v749_v10, %v1762_v48  ;;  %v818_v12 = vadd.f32 %v817_v9, %v787_v7  ;;  %v792_v48 = vmul.f32 %v1778_v8, %v1778_v8  ;;  %p1461_p13 = pnand %p1460_p10, %p1657_p12  ;;  %p1467_p9 = scmp.lt.s32.totalorder %s1465_s30, %s1459_s16 }
 0x182   : > { %v819_v14 = vadd.f32 %v818_v12, %v788_v27  ;;  %v751_v34 = vadd.f32 %v750_v11, %v1768_v57  ;;  %p1462_p3 = pneg %p1461_p13  ;;  %p1468_p1 = por %p1467_p9, %p1466_p7 }
 0x184   : > { %v752_v16 = vadd.f32 %v1760_v46, %v751_v34  ;;  %v820_v18 = vadd.f32 %v819_v14, %v789_v15  ;;  %v794_v46 = vmul.f32 %v1776_v6, %v1776_v6  ;;  %p1469_p0 = pnand %p1468_p1, %p1462_p3 }
 0x186   : > { %v821_v19 = vadd.f32 %v820_v18, %v790_v25  ;;  %v753_v20 = vadd.f32 %v1764_v53, %v752_v16  ;;  %v795_v53 = vmul.f32 %v1780_v13, %v1780_v13 }
 0x188   : > { %v754_v21 = vadd.f32 %v753_v20, %v1778_v8  ;;  %v822_v22 = vadd.f32 %v821_v19, %v791_v29  ;;  %v796_v8 = vmul.f32 %v1794_v36, %v1794_v36 }
 0x18a   : > { %v823_v23 = vadd.f32 %v822_v22, %v792_v48  ;;  %v755_v57 = vadd.f32 %v754_v21, %v1784_v17 }
 0x18c   : > { %v756_v26 = vadd.f32 %v1776_v6, %v755_v57  ;;  %v824_v28 = vadd.f32 %v823_v23, %v793_v24  ;;  %v797_v6 = vmul.f32 %v1802_v45, %v1802_v45 }
 0x18e   : > { %v825_v30 = vadd.f32 %v824_v28, %v794_v46  ;;  %v757_v31 = vadd.f32 %v1780_v13, %v756_v26  ;;  %v799_v13 = vmul.f32 %v1798_v41, %v1798_v41 }
 0x190   : > { %v758_v32 = vadd.f32 %v757_v31, %v1794_v36  ;;  %v826_v35 = vadd.f32 %v825_v30, %v795_v53 }
 0x192   : > { %v827_v37 = vadd.f32 %v826_v35, %v796_v8  ;;  %v759_v17 = vadd.f32 %v758_v32, %v1802_v45 }
 0x194   : > { %v760_v39 = vadd.f32 %v1792_v33, %v759_v17  ;;  %v828_v40 = vadd.f32 %v827_v37, %v797_v6 }
 0x196   : > { %v761_v42 = vadd.f32 %v1798_v41, %v760_v39  ;;  %v829_v36 = vadd.f32 %v828_v40, %v798_v38 }
 0x198   : > { %v762_v43 = vrot.slane %v761_v42, 4  ;;  %v830_v44 = vadd.f32 %v829_v36, %v799_v13 }
 0x19a   : > { %v763_v47 = vadd.f32 %v762_v43, %v761_v42  ;;  %v831_v49 = vrot.slane %v830_v44, 4 }
 0x19c   : > { %v764_v51 = vrot.slane %v763_v47, 2  ;;  %v832_v45 = vadd.f32 %v831_v49, %v830_v44 }
 0x19e   : > { %v765_v52 = vadd.f32 %v764_v51, %v763_v47  ;;  %v833_v54 = vrot.slane %v832_v45, 2 }
 0x1a0   : > { %v834_v33 = vadd.f32 %v833_v54, %v832_v45  ;;  %v766_v56 = vrot.slane %v765_v52, 1 }
 0x1a2   : > { %v835_v58 = vrot.slane %v834_v33, 1  ;;  %v767_v59 = vadd.f32 %v766_v56, %v765_v52 }
 0x1a4   : > { %v836_v41 = vadd.f32 %v835_v58, %v834_v33 }
 0x1a6   : > { %v841_v60 = vsel %vm840_vm0, %v836_v41, 0.0 }
 0x1a7   : > { %v842_v61 = vsel %vm839_vm1, %v767_v59, %v841_v60 }
 0x1a8   : > { %843 = vst [vmem:[%s214_s4] sm:$0xff] %v842_v61 }
 0x1a9   : > { %1472 = shalt.err (!%p1469_p0)
}
 0x1aa   : > { %s1473_s6 = scalar_lea.hbm %s1894_s27, 128  ;;  %s1477_s10 = scalar_lea.hbm %s1941_s3, 256 }
 0x1ab   : > { %p1474_p5 = scmp.ne.s32.totalorder %s1894_s27, %s1473_s6  ;;  %p1478_p4 = scmp.lt.u32.totalorder %s1894_s27, %s1941_s3 }
 0x1ac   : > { %p1479_p6 = scmp.lt.u32.totalorder %s1477_s10, %s1473_s6  ;;  %p1481_p10 = scmp.lt.u32.totalorder %s1473_s6, %s1894_s27 }
 0x1ad   : > { %p1475_p11 = pnand %p1474_p5, %p1657_p12 }
 0x1ae   : > { %p1480_p8 = por %p1479_p6, %p1478_p4 }
 0x1af   : > { %p1476_p2 = pneg %p1475_p11 }
 0x1b0   : > { %p1482_p13 = por %p1481_p10, %p1480_p8 }
 0x1b2   : > { %p1483_p3 = pnand %p1482_p13, %p1476_p2 }
 0x1b4   : > { %1486 = shalt.err (!%p1483_p3)
}
 0x1b5   : > { %1290 = dma.vmem_to_hbm [thread:$0]  (%p1657_p12), %s1896_s25, 128, %s1894_s27, %s850_s28  }
 0x1b6 PF: > { %s891_s20 = sand.u32 1, %s1521_s12   ;;  %p1956_p7 = scmp.ne.s32.totalorder %s1946_s19, 0 }
 0x1b7   : > { %p1957_p9 = scmp.ge.s32.totalorder %s1533_s15, 2  ;;  %s892_s8 = scalar_lea.sflag [#allocation4], %s891_s20 }
 0x1b9   : > { %p1302_p1 = pnand %p1957_p9, %p1956_p7 }
 0x1bb   : > { %1512 = dma.done.wait (!%p1302_p1), %s892_s8, 2048  }
 0x1bc   : > { %1514 = vsyncadd (!%p1302_p1), %s892_s8, 4294965248  ;;  %s901_s9 = scalar_lea.sflag [#allocation9], %s891_s20 }
 0x1bd   : > { %1516 = dma.done.wait (!%p1302_p1), %s901_s9, 128  }
 0x1be   : > { %1518 = vsyncadd (!%p1302_p1), %s901_s9, 4294967168  ;;  %p21_p12 = scmp.ge.s32.totalorder %s1619_s24, 4   ;;  %s1958_s12 = smov %s1525_s13 }
 0x1bf   : > { %s1959_s13 = smov %s1529_s14  ;;  %s1960_s14 = smov %s1653_s17 }
 0x1c0   : > { %s1961_s15 = smov %s1619_s24  ;;  %23 = sbr.rel (!%p21_p12) target bundleno = 8 (0x8), region = 94 }
 0x1c7   :  { %906 = vsyncpa [#allocation3], 1 }
 0x1c8   :  { %908 = vsyncpa [#allocation3 + $0x1], 1 }
 0x1c9   :  { %909 = vsyncpa [#allocation6], 1 }
 0x1ca   :  { %910 = vsyncpa [#allocation4], 1 }
 0x1cb   :  { %912 = vsyncpa [#allocation4 + $0x1], 1 }
 0x1cc   :  { %913 = vsyncpa [#allocation9], 1 }
 0x1cd   :  { %915 = vsyncpa [#allocation9 + $0x1], 1 }

</bundles_post_ra>
